<compile_context>
chip_gen: v7x
topology: tpu7x:2x2x1
jax: 0.10.0
libtpu: 0.0.40
codegen_flags: <defaults>
</compile_context>

<pallas_src>
import functools

import jax
import jax.numpy as jnp
from jax.experimental import pallas as pl
from jax.experimental.pallas import tpu as pltpu

BN_EPS = 1e-5
LANES = 128


def _round_up(x, m):
    return ((x + m - 1) // m) * m


# --------------------------------------------------------------------------
# Fused single-kernel path (whole lane-dense batch resident in VMEM).
# --------------------------------------------------------------------------
def _fused_kernel(x_ref, gmat_ref, gamma_ref, beta_ref, w_ref, b_ref, o_ref,
                  *, inv_n):
    # x_ref:      [nd, 128]   lane-dense eigvecs (r node rows per lane row)
    # gmat_ref:   [128, 128]  0/1 "same frequency" matrix for cross-group sums
    # gamma/beta: [1, 128]    BN affine params tiled to the lane layout (f32)
    # w_ref:      [128, r*Dp] block-diagonal linear weight (compute dtype)
    # b_ref:      [1, r*Dp]   tiled bias (f32)
    x = x_ref[...]
    x = jnp.where(jnp.isnan(x), 0.0, x)
    # Per-lane sums; the reduction over the r interleaved node groups is one
    # tiny MXU matmul with the 0/1 same-frequency matrix, so the result stays
    # lane-tiled (no cross-lane relayout needed).
    s = jnp.sum(x, axis=0, keepdims=True)
    sq = jnp.sum(x * x, axis=0, keepdims=True)
    mean = jnp.dot(s, gmat_ref[...], preferred_element_type=jnp.float32) * inv_n
    msq = jnp.dot(sq, gmat_ref[...], preferred_element_type=jnp.float32) * inv_n
    var = jnp.maximum(msq - mean * mean, 0.0)          # biased var (BN training)
    scale = gamma_ref[...] * jax.lax.rsqrt(var + BN_EPS)
    shift = beta_ref[...] - mean * scale
    xn = x * scale + shift
    out = jnp.dot(xn.astype(w_ref.dtype), w_ref[...],
                  preferred_element_type=jnp.float32)
    o_ref[...] = (out + b_ref[...]).astype(o_ref.dtype)


# --------------------------------------------------------------------------
# Streaming two-phase path.
# --------------------------------------------------------------------------
def _stats_kernel(x_ref, sum_ref, sq_ref, *, blocks_per_core, n_valid_rows):
    # Phase 1: per-lane sum / sum-of-squares.  grid = (2, blocks_per_core); the
    # leading "parallel" axis splits the node blocks across the two TensorCores
    # on v7x (it is just a harmless sequential outer loop on v5e/v6e).
    c = pl.program_id(0)
    i = pl.program_id(1)

    @pl.when(i == 0)
    def _():
        sum_ref[...] = jnp.zeros_like(sum_ref)
        sq_ref[...] = jnp.zeros_like(sq_ref)

    tn = x_ref.shape[0]
    logical_block = c * blocks_per_core + i
    rows = logical_block * tn + jax.lax.broadcasted_iota(
        jnp.int32, (tn, LANES), 0)
    x = x_ref[...]
    # One select masks NaNs, grid-overhang garbage rows and the duplicated
    # (clamped) phantom block on the second core.
    x = jnp.where((rows < n_valid_rows) & (~jnp.isnan(x)), x, 0.0)
    if tn % 8 != 0:
        # Only when a single block equals a tiny full array; static pad.
        x = jnp.pad(x, ((0, (-tn) % 8), (0, 0)))
    # Full-vreg [8,128] accumulators: the inner reduction is pure VPU vreg adds;
    # the final 8->1 sublane reduce happens once in the XLA fold.
    xr = x.reshape(-1, 8, LANES)
    sum_ref[...] += jnp.sum(xr, axis=0)[None]
    sq_ref[...] += jnp.sum(xr * xr, axis=0)[None]


def _apply_kernel(x_ref, w_ref, b_ref, o_ref):
    # Phase 2: NaN mask + folded (BN o Linear) as one lane-dense MXU matmul.
    x = x_ref[...]
    x = jnp.where(jnp.isnan(x), 0.0, x)
    out = jnp.dot(x.astype(w_ref.dtype), w_ref[...],
                  preferred_element_type=jnp.float32)
    o_ref[...] = (out + b_ref[...]).astype(o_ref.dtype)


# --------------------------------------------------------------------------
# Wrapper.
# --------------------------------------------------------------------------
def equivstable_lappe_encode(eigvecs, bn_gamma, bn_beta, lin_weight, lin_bias,
                             *, block_rows=2048, stats_block_rows=4096,
                             max_fused_rows=2048,
                             compute_dtype=jnp.bfloat16,
                             out_dtype=jnp.bfloat16):
    """EquivStableLapPE encoder forward.

    eigvecs: [N, K] float (may contain NaN padding).  bn_gamma/bn_beta: [K].
    lin_weight: [D, K] (PyTorch Linear layout).  lin_bias: [D].
    Returns pe: [N, D] in out_dtype.
    """
    n, k = eigvecs.shape
    d = lin_weight.shape[0]
    assert k <= LANES, "max_freqs must be <= 128"

    # ---- lane-dense packing geometry -------------------------------------
    k_pad = max(8, pl.next_power_of_2(k))
    r = LANES // k_pad                      # node rows packed per lane row
    # Guard: keep the lane-dense output width a multiple of 128 so phase-2
    # stores stay unmasked full-lane vst's (pad dim_emb if needed).
    d_pad = d if (r * d) % LANES == 0 else _round_up(d, LANES // r)
    width = r * d_pad

    x = eigvecs.astype(jnp.float32)
    if k_pad != k:
        x = jnp.pad(x, ((0, 0), (0, k_pad - k)))
    # Node axis only needs padding to a multiple of r (<= r-1 rows) so the
    # row-major reshape to the lane-dense layout is valid.  Tile remainders
    # are handled by partial grid blocks + in-kernel masking instead of
    # padding to a multiple of the tile size.
    n_r = _round_up(n, r)
    if n_r != n:
        # TODO(synk): this small pad still copies eigvecs once in XLA; it is a
        # no-op whenever the caller supplies N as a multiple of 128//k_pad.
        x = jnp.pad(x, ((0, n_r - n), (0, 0)))
    nd = n_r // r
    x_dense = x.reshape(nd, LANES)          # free row-major reshape

    # ---- shared parameter prep (tiny, f32) --------------------------------
    w_t = jnp.pad(lin_weight.T.astype(jnp.float32),
                  ((0, k_pad - k), (0, d_pad - d)))            # [k_pad, d_pad]
    bias = jnp.pad(lin_bias.astype(jnp.float32), (0, d_pad - d))
    gamma = jnp.pad(bn_gamma.astype(jnp.float32), (0, k_pad - k))
    beta = jnp.pad(bn_beta.astype(jnp.float32), (0, k_pad - k))
    eye_r = jnp.eye(r, dtype=jnp.float32)

    out_itemsize = jnp.dtype(out_dtype).itemsize
    cw_itemsize = jnp.dtype(compute_dtype).itemsize

    fused_bytes = (nd * (LANES * 4 + width * out_itemsize)
                   + LANES * width * cw_itemsize + LANES * LANES * 4)
    use_fused = (nd <= max_fused_rows) and (fused_bytes <= (12 << 20))

    if use_fused:
        # ---- fused path: one HBM read of x, no inter-kernel XLA fold ------
        # BN is applied to x in-kernel, so the block-diagonal weight depends
        # only on static parameters.
        w_block = jnp.einsum('rs,kd->rksd', eye_r, w_t).reshape(LANES, width)
        b_block = jnp.tile(bias, r)[None, :]
        gamma_l = jnp.tile(gamma, r)[None, :]
        beta_l = jnp.tile(beta, r)[None, :]
        ii = jnp.arange(LANES, dtype=jnp.int32)
        gmat = (ii[:, None] % k_pad == ii[None, :] % k_pad).astype(jnp.float32)

        out_dense = pl.pallas_call(
            functools.partial(_fused_kernel, inv_n=1.0 / n),
            out_shape=jax.ShapeDtypeStruct((nd, width), out_dtype),
        )(x_dense, gmat, gamma_l, beta_l,
          w_block.astype(compute_dtype), b_block)
    else:
        # ---- phase 1: streaming per-lane sum / sum-of-squares -------------
        tn1 = nd if nd <= stats_block_rows else stats_block_rows
        nblocks1 = pl.cdiv(nd, tn1)
        bpc = pl.cdiv(nblocks1, 2)          # blocks per TensorCore (v7x: 2 TCs)
        cost1 = pl.CostEstimate(
            flops=4 * nd * LANES, transcendentals=0,
            bytes_accessed=4 * nd * LANES + 4 * 2 * 2 * 8 * LANES)
        acc_sum, acc_sq = pl.pallas_call(
            functools.partial(_stats_kernel, blocks_per_core=bpc,
                              n_valid_rows=nd),
            out_shape=(jax.ShapeDtypeStruct((2, 8, LANES), jnp.float32),
                       jax.ShapeDtypeStruct((2, 8, LANES), jnp.float32)),
            grid=(2, bpc),
            in_specs=[pl.BlockSpec(
                (tn1, LANES),
                lambda c, i: (jnp.minimum(c * bpc + i, nblocks1 - 1), 0))],
            out_specs=(pl.BlockSpec((1, 8, LANES), lambda c, i: (c, 0, 0)),
                       pl.BlockSpec((1, 8, LANES), lambda c, i: (c, 0, 0))),
            compiler_params=pltpu.CompilerParams(
                dimension_semantics=("parallel", "arbitrary")),
            cost_estimate=cost1,
        )(x_dense)

        # ---- fold BN into the linear (tiny XLA ops, f32) -------------------
        sum_k = acc_sum.sum(axis=(0, 1)).reshape(r, k_pad).sum(axis=0)
        sq_k = acc_sq.sum(axis=(0, 1)).reshape(r, k_pad).sum(axis=0)
        inv_n = jnp.float32(1.0 / n)
        mean = sum_k * inv_n
        var = jnp.maximum(sq_k * inv_n - mean * mean, 0.0)   # biased, BN train
        scale = gamma * jax.lax.rsqrt(var + BN_EPS)
        w_eff = scale[:, None] * w_t                          # [k_pad, d_pad]
        b_eff = bias + (beta - mean * scale) @ w_t            # [d_pad]
        # Block-diagonal weight so the lane-dense [*,128] input maps directly
        # to a lane-dense [*, r*Dp] output (row-major identical to [N, Dp]).
        w_block = jnp.einsum('rs,kd->rksd', eye_r, w_eff).reshape(LANES, width)
        b_block = jnp.tile(b_eff, r)[None, :]

        # ---- phase 2: mask + folded matmul, parallel over node tiles ------
        tn2 = block_rows if nd > block_rows else nd
        # VMEM sanity cap (v7x: 64 MiB physical / 32 MiB default scoped).
        per_row_bytes = 2 * LANES * 4 + 2 * width * out_itemsize
        while tn2 > 8 and tn2 * per_row_bytes > (16 << 20):
            tn2 //= 2
        if tn2 != nd:
            tn2 = max(8, (tn2 // 8) * 8)
        cost2 = pl.CostEstimate(
            flops=2 * nd * LANES * width, transcendentals=0,
            bytes_accessed=(4 * nd * LANES + out_itemsize * nd * width
                            + cw_itemsize * LANES * width))
        out_dense = pl.pallas_call(
            _apply_kernel,
            out_shape=jax.ShapeDtypeStruct((nd, width), out_dtype),
            grid=(pl.cdiv(nd, tn2),),
            in_specs=[
                pl.BlockSpec((tn2, LANES), lambda i: (i, 0)),
                # Constant index maps: fetched once.  The redundant second
                # buffer of the ~128 KiB weight is negligible, so the
                # pipeline_mode=Buffered(1) micro-opt is intentionally skipped.
                pl.BlockSpec((LANES, width), lambda i: (0, 0)),
                pl.BlockSpec((1, width), lambda i: (0, 0)),
            ],
            out_specs=pl.BlockSpec((tn2, width), lambda i: (i, 0)),
            compiler_params=pltpu.CompilerParams(
                dimension_semantics=("parallel",)),
            cost_estimate=cost2,
        )(x_dense, w_block.astype(compute_dtype), b_block)

    out = out_dense.reshape(n_r, d_pad)[:n]
    if d_pad != d:
        out = out[:, :d]
    return out


def _reference(eigvecs, bn_gamma, bn_beta, lin_weight, lin_bias):
    x = jnp.where(jnp.isnan(eigvecs), 0.0, eigvecs)
    mean = jnp.mean(x, axis=0, keepdims=True)
    var = jnp.mean((x - mean) ** 2, axis=0, keepdims=True)
    xn = (x - mean) / jnp.sqrt(var + BN_EPS)
    xn = xn * bn_gamma[None, :] + bn_beta[None, :]
    return xn @ lin_weight.T + lin_bias[None, :]


if __name__ == "__main__":
    MAX_FREQS = 8   # cfg.posenc_EquivStableLapPE.eigen.max_freqs
    DIM_EMB = 32    # dim_emb

    def make_inputs(n, salt):
        key = jax.random.fold_in(jax.random.PRNGKey(0), salt)
        k_x, k_w, k_b, k_g, k_bb, k_m = jax.random.split(key, 6)
        eig = jax.random.normal(k_x, (n, MAX_FREQS), dtype=jnp.float32)
        nan_mask = jax.random.bernoulli(k_m, 0.1, (n, MAX_FREQS))
        eig = jnp.where(nan_mask, jnp.nan, eig)   # padded-eigvec NaNs
        w = jax.random.normal(k_w, (DIM_EMB, MAX_FREQS), jnp.float32) * 0.1
        b = jax.random.normal(k_b, (DIM_EMB,), jnp.float32) * 0.01
        g = 1.0 + 0.05 * jax.random.normal(k_g, (MAX_FREQS,), jnp.float32)
        bt = 0.05 * jax.random.normal(k_bb, (MAX_FREQS,), jnp.float32)
        return eig, g, bt, w, b

    # --- Case A: small graph batch -> fused single-kernel path -------------
    eig_a, g_a, bt_a, w_a, b_a = make_inputs(70, 0)
    ref_a = _reference(eig_a, g_a, bt_a, w_a, b_a)

    pe_a32 = equivstable_lappe_encode(eig_a, g_a, bt_a, w_a, b_a,
                                      compute_dtype=jnp.float32,
                                      out_dtype=jnp.float32)
    pe_a32 = jax.block_until_ready(pe_a32)
    assert pe_a32.shape == (70, DIM_EMB)
    assert jnp.allclose(pe_a32, ref_a, atol=2e-4, rtol=2e-4), "fused f32 mismatch"

    pe_abf = equivstable_lappe_encode(eig_a, g_a, bt_a, w_a, b_a)  # bf16 defaults
    pe_abf = jax.block_until_ready(pe_abf)
    assert pe_abf.dtype == jnp.bfloat16
    assert jnp.allclose(pe_abf.astype(jnp.float32), ref_a,
                        atol=3e-2, rtol=3e-2), "fused bf16 mismatch"

    # --- Case B: larger batch, small tiles -> streaming two-phase path -----
    # (exercises partial last blocks, the 2-way phase-1 core split and the
    #  folded-BN matmul).
    eig_b, g_b, bt_b, w_b, b_b = make_inputs(3000, 1)
    ref_b = _reference(eig_b, g_b, bt_b, w_b, b_b)
    kwargs_b = dict(block_rows=64, stats_block_rows=64, max_fused_rows=0)

    pe_b32 = equivstable_lappe_encode(eig_b, g_b, bt_b, w_b, b_b,
                                      compute_dtype=jnp.float32,
                                      out_dtype=jnp.float32, **kwargs_b)
    pe_b32 = jax.block_until_ready(pe_b32)
    assert pe_b32.shape == (3000, DIM_EMB)
    assert jnp.allclose(pe_b32, ref_b, atol=5e-4, rtol=5e-4), \
        "two-phase f32 mismatch"

    pe_bbf = equivstable_lappe_encode(eig_b, g_b, bt_b, w_b, b_b, **kwargs_b)
    pe_bbf = jax.block_until_ready(pe_bbf)
    assert jnp.allclose(pe_bbf.astype(jnp.float32), ref_b,
                        atol=3e-2, rtol=3e-2), "two-phase bf16 mismatch"

    print("KERNEL_OK")
</pallas_src>

<mosaic_0001>
module attributes {stable_mosaic.version = 11 : i64} {
  func.func @_fused_kernel(%arg0: memref<5x128xf32, #tpu.memory_space<vmem>>, %arg1: memref<128x128xf32, #tpu.memory_space<vmem>>, %arg2: memref<1x128xf32, #tpu.memory_space<vmem>>, %arg3: memref<1x128xf32, #tpu.memory_space<vmem>>, %arg4: memref<128x512xf32, #tpu.memory_space<vmem>>, %arg5: memref<1x512xf32, #tpu.memory_space<vmem>>, %arg6: memref<5x512xf32, #tpu.memory_space<vmem>>) attributes {dimension_semantics = [], scalar_prefetch = 0 : i64, scratch_operands = 0 : i64, tpu.core_type = #tpu.core_type<tc>} {
    %c0 = arith.constant 0 : index
    %c0_0 = arith.constant 0 : index
    %0 = vector.load %arg0[%c0, %c0_0] : memref<5x128xf32, #tpu.memory_space<vmem>>, vector<5x128xf32>
    %1 = arith.cmpf one, %0, %0 : vector<5x128xf32>
    %cst = arith.constant 0.000000e+00 : f32
    %2 = vector.broadcast %cst : f32 to vector<5x128xf32>
    %3 = arith.select %1, %2, %0 : vector<5x128xi1>, vector<5x128xf32>
    %cst_1 = arith.constant dense<0.000000e+00> : vector<128xf32>
    %4 = vector.multi_reduction <add>, %3, %cst_1 [0] : vector<5x128xf32> to vector<128xf32>
    %5 = vector.shape_cast %4 : vector<128xf32> to vector<1x128xf32>
    %6 = arith.mulf %3, %3 : vector<5x128xf32>
    %cst_2 = arith.constant dense<0.000000e+00> : vector<128xf32>
    %7 = vector.multi_reduction <add>, %6, %cst_2 [0] : vector<5x128xf32> to vector<128xf32>
    %8 = vector.shape_cast %7 : vector<128xf32> to vector<1x128xf32>
    %c0_3 = arith.constant 0 : index
    %c0_4 = arith.constant 0 : index
    %9 = vector.load %arg1[%c0_3, %c0_4] : memref<128x128xf32, #tpu.memory_space<vmem>>, vector<128x128xf32>
    %cst_5 = arith.constant dense<0.000000e+00> : vector<1x128xf32>
    %10 = tpu.matmul %5, %9, %cst_5 {dimension_numbers = #tpu.dot_dimension_numbers<[1], [0], [0], [1], [0, 0, 1, 1], [], []>} : vector<1x128xf32>, vector<128x128xf32>, vector<1x128xf32> -> vector<1x128xf32>
    %cst_6 = arith.constant 0.0142857144 : f32
    %11 = vector.broadcast %cst_6 : f32 to vector<1x128xf32>
    %12 = arith.mulf %10, %11 : vector<1x128xf32>
    %c0_7 = arith.constant 0 : index
    %c0_8 = arith.constant 0 : index
    %13 = vector.load %arg1[%c0_7, %c0_8] : memref<128x128xf32, #tpu.memory_space<vmem>>, vector<128x128xf32>
    %cst_9 = arith.constant dense<0.000000e+00> : vector<1x128xf32>
    %14 = tpu.matmul %8, %13, %cst_9 {dimension_numbers = #tpu.dot_dimension_numbers<[1], [0], [0], [1], [0, 0, 1, 1], [], []>} : vector<1x128xf32>, vector<128x128xf32>, vector<1x128xf32> -> vector<1x128xf32>
    %cst_10 = arith.constant 0.0142857144 : f32
    %15 = vector.broadcast %cst_10 : f32 to vector<1x128xf32>
    %16 = arith.mulf %14, %15 : vector<1x128xf32>
    %17 = arith.mulf %12, %12 : vector<1x128xf32>
    %18 = arith.subf %16, %17 : vector<1x128xf32>
    %cst_11 = arith.constant 0.000000e+00 : f32
    %19 = vector.broadcast %cst_11 : f32 to vector<1x128xf32>
    %20 = arith.maximumf %18, %19 : vector<1x128xf32>
    %c0_12 = arith.constant 0 : index
    %c0_13 = arith.constant 0 : index
    %21 = vector.load %arg2[%c0_12, %c0_13] : memref<1x128xf32, #tpu.memory_space<vmem>>, vector<1x128xf32>
    %cst_14 = arith.constant 9.99999974E-6 : f32
    %22 = vector.broadcast %cst_14 : f32 to vector<1x128xf32>
    %23 = arith.addf %20, %22 : vector<1x128xf32>
    %24 = math.rsqrt %23 : vector<1x128xf32>
    %25 = arith.mulf %21, %24 : vector<1x128xf32>
    %c0_15 = arith.constant 0 : index
    %c0_16 = arith.constant 0 : index
    %26 = vector.load %arg3[%c0_15, %c0_16] : memref<1x128xf32, #tpu.memory_space<vmem>>, vector<1x128xf32>
    %27 = arith.mulf %12, %25 : vector<1x128xf32>
    %28 = arith.subf %26, %27 : vector<1x128xf32>
    %29 = vector.broadcast %25 : vector<1x128xf32> to vector<5x128xf32>
    %30 = arith.mulf %3, %29 : vector<5x128xf32>
    %31 = vector.broadcast %28 : vector<1x128xf32> to vector<5x128xf32>
    %32 = arith.addf %30, %31 : vector<5x128xf32>
    %c0_17 = arith.constant 0 : index
    %c0_18 = arith.constant 0 : index
    %33 = vector.load %arg4[%c0_17, %c0_18] : memref<128x512xf32, #tpu.memory_space<vmem>>, vector<128x512xf32>
    %cst_19 = arith.constant dense<0.000000e+00> : vector<5x512xf32>
    %34 = tpu.matmul %32, %33, %cst_19 {dimension_numbers = #tpu.dot_dimension_numbers<[1], [0], [0], [1], [0, 0, 1, 1], [], []>} : vector<5x128xf32>, vector<128x512xf32>, vector<5x512xf32> -> vector<5x512xf32>
    %c0_20 = arith.constant 0 : index
    %c0_21 = arith.constant 0 : index
    %35 = vector.load %arg5[%c0_20, %c0_21] : memref<1x512xf32, #tpu.memory_space<vmem>>, vector<1x512xf32>
    %36 = vector.broadcast %35 : vector<1x512xf32> to vector<5x512xf32>
    %37 = arith.addf %34, %36 : vector<5x512xf32>
    %c0_22 = arith.constant 0 : index
    %c0_23 = arith.constant 0 : index
    %38 = vector.load %arg6[%c0_22, %c0_23] : memref<5x512xf32, #tpu.memory_space<vmem>>, vector<5x512xf32>
    tpu.vector_store %arg6[%c0_22, %c0_23], %37 {strides = array<i32>} : memref<5x512xf32, #tpu.memory_space<vmem>>, vector<5x512xf32>,
    return
  }
}

</mosaic_0001>

<bundles_post_ra>
// kernel: tpu_custom_call.1
= control target key start
LH: loop header
LB: loop body
LE: loop exit
PB: predicated region body
PF: predicated region fallthrough
CT: control target
= control target key end

     0   :  { %11 = vsyncpa [#allocation3], 0  ;;  %s964_s0 = inlined_call_operand.hbm [shape: f32[5,128], index: 0, kind: input, shape index: {}]   ;;  %s965_s1 = inlined_call_operand.hbm [shape: f32[128,128], index: 1, kind: input, shape index: {}]   ;;  %s966_s2 = inlined_call_operand.vmem [shape: f32[1,128], index: 2, kind: input, shape index: {}]   ;;  %s967_s3 = inlined_call_operand.vmem [shape: f32[1,128], index: 3, kind: input, shape index: {}]   ;;  %s968_s4 = inlined_call_operand.hbm [shape: f32[128,512], index: 4, kind: input, shape index: {}]   ;;  %s969_s5 = inlined_call_operand.vmem [shape: f32[1,512], index: 5, kind: input, shape index: {}]   ;;  %s970_s6 = inlined_call_operand.hbm [shape: f32[5,512], index: 6, kind: output, shape index: {}]  }
   0x1   :  { %12 = vsyncpa [#allocation6], 0 }
   0x2   :  { %13 = vsyncpa [#allocation4], 0  ;;  %s835_s21 = smov [#allocation5]   ;;  %s741_s25 = scalar_lea.hbm %s965_s1, 2048 }
   0x3   :  { %s29_s22 = sshll.u32 %s835_s21, 4  ;;  %p742_p0 = scmp.ne.s32.totalorder %s965_s1, %s741_s25  ;;  %s30_s22 = int_to_ptr.vmem [resolvable:$true] %s29_s22 }
   0x4   :  { %p745_p1 = scmp.lt.u32.totalorder %s741_s25, %s965_s1 }
   0x6   :  { %p747_p2 = pnand %p745_p1, %p742_p0 }
   0x8   :  { %750 = shalt.err (!%p747_p2)
}
   0x9   :  { %s751_s30 = scalar_lea.vmem %s30_s22, 2048  ;;  %p756_p4 = scmp.lt.s32.totalorder %s30_s22, %s30_s22 }
   0xa   :  { %p752_p3 = scmp.ne.s32.totalorder %s30_s22, %s751_s30  ;;  %p757_p5 = scmp.lt.s32.totalorder %s751_s30, %s751_s30 }
   0xc   :  { %p758_p6 = por %p757_p5, %p756_p4 }
   0xe   :  { %p759_p7 = pnand %p758_p6, %p752_p3 }
  0x10   :  { %762 = shalt.err (!%p759_p7)
}
  0x11   :  { %s836_s7 = smov 128   ;;  %s837_s8 = smov 8  }
  0x12   :  { %35 = dma.hbm_to_vmem [thread:$0]  %s965_s1, 2048, %s30_s22, [#allocation6], %s836_s7, %s836_s7, %s837_s8  }
  0x13   :  { %s838_s11 = smov [#allocation2]   ;;  %s839_s13 = smov [#allocation7]  }
  0x14   :  { %s20_s12 = sshll.u32 %s838_s11, 4  ;;  %s45_s14 = sshll.u32 %s839_s13, 4  ;;  %s21_s12 = int_to_ptr.vmem [resolvable:$true] %s20_s12  ;;  %s46_s14 = int_to_ptr.vmem [resolvable:$true] %s45_s14 }
  0x15   :  { %s763_s17 = scalar_lea.hbm %s964_s0, 128 }
  0x16   :  { %p764_p8 = scmp.ne.s32.totalorder %s964_s0, %s763_s17  ;;  %p767_p9 = scmp.lt.u32.totalorder %s763_s17, %s964_s0 }
  0x18   :  { %p769_p10 = pnand %p767_p9, %p764_p8 }
  0x1a   :  { %772 = shalt.err (!%p769_p10)
}
  0x1b   :  { %s773_s1 = scalar_lea.vmem %s21_s12, 128  ;;  %p778_p12 = scmp.lt.s32.totalorder %s21_s12, %s21_s12 }
  0x1c   :  { %p774_p11 = scmp.ne.s32.totalorder %s21_s12, %s773_s1  ;;  %p779_p13 = scmp.lt.s32.totalorder %s773_s1, %s773_s1 }
  0x1e   :  { %p780_p0 = por %p779_p13, %p778_p12 }
  0x20   :  { %p781_p1 = pnand %p780_p0, %p774_p11 }
  0x22   :  { %784 = shalt.err (!%p781_p1)
}
  0x23   :  { %23 = dma.hbm_to_vmem [thread:$0]  %s964_s0, 128, %s21_s12, [#allocation3]  }
  0x24   :  { %s785_s26 = scalar_lea.hbm %s968_s4, 8192 }
  0x25   :  { %p786_p2 = scmp.ne.s32.totalorder %s968_s4, %s785_s26  ;;  %p789_p3 = scmp.lt.u32.totalorder %s785_s26, %s968_s4 }
  0x27   :  { %p791_p4 = pnand %p789_p3, %p786_p2 }
  0x29   :  { %794 = shalt.err (!%p791_p4)
}
  0x2a   :  { %s795_s7 = scalar_lea.vmem %s46_s14, 8192  ;;  %p800_p6 = scmp.lt.s32.totalorder %s46_s14, %s46_s14 }
  0x2b   :  { %p796_p5 = scmp.ne.s32.totalorder %s46_s14, %s795_s7  ;;  %p801_p7 = scmp.lt.s32.totalorder %s795_s7, %s795_s7 }
  0x2d   :  { %p802_p8 = por %p801_p7, %p800_p6 }
  0x2f   :  { %p803_p9 = pnand %p802_p8, %p796_p5 }
  0x31   :  { %806 = shalt.err (!%p803_p9)
}
  0x32   :  { %s840_s0 = smov 512   ;;  %s841_s8 = smov 32  }
  0x33   :  { %51 = dma.hbm_to_vmem [thread:$0]  %s968_s4, 8192, %s46_s14, [#allocation6], %s840_s0, %s840_s0, %s841_s8  }
  0x34   :  { %829 = dma.done.wait [#allocation3], 128  }
  0x35   :  { %830 = vsyncadd [#allocation3], 4294967168 }
  0x36   :  { %831 = dma.done.wait [#allocation6], 10240  }
  0x37   :  { %832 = vsyncadd [#allocation6], 4294957056  ;;  %v842_v0 = vmov 0.0|0.0   ;;  %vm843_vm0 = vmmov 0   ;;  %v844_v1 = vmov 0.0   ;;  %v82_v2 = vld [vmem:[#allocation5] sm:$0xff] }
  0x38   :  { %616 = vmatprep.subr.bf16.mxu0 %v842_v0  ;;  %640 = vmatprep.subr.bf16.mxu1 %v842_v0  ;;  %v83_v3 = vld [vmem:[#allocation5 + $0x8] sm:$0xff]  ;;  %v84_v4 = vld [vmem:[#allocation5 + $0x10] sm:$0xff]  ;;  %v85_v6 = vld [vmem:[#allocation5 + $0x18] sm:$0xff]  ;;  %vm66_vm1 = vcmask 1044480  }
  0x39   :  { %578 = vmatprep.mubr.msk.f32.mxu0 %vm843_vm0, %v844_v1  ;;  %613 = vmatprep.mubr.msk.f32.mxu1 %vm843_vm0, %v844_v1  ;;  %v617_v5 = vpack.c.bf16 %v83_v3, %v82_v2  ;;  %v620_v7 = vpack.c.bf16 %v85_v6, %v84_v4  ;;  %v86_v8 = vld [vmem:[#allocation5 + $0x20] sm:$0xff]  ;;  %v87_v9 = vld [vmem:[#allocation5 + $0x28] sm:$0xff]  ;;  %v63_v10 = vld [vmem:[#allocation2] sm:$0x1f] }
  0x3a   :  { %vm64_vm2 = vcmp.ne.f32.partialorder %v63_v10, %v63_v10  ;;  %v623_v11 = vpack.c.bf16 %v87_v9, %v86_v8  ;;  %v88_v13 = vld [vmem:[#allocation5 + $0x30] sm:$0xff]  ;;  %v89_v14 = vld [vmem:[#allocation5 + $0x38] sm:$0xff]  ;;  %v90_v21 = vld [vmem:[#allocation5 + $0x40] sm:$0xff] }
  0x3b   :  { %618 = vmatpush3.bf16.msra.mxu0 %v617_v5  ;;  %642 = vmatpush3.bf16.msra.mxu1 %v617_v5  ;;  %v923_v12 = vsel %vm64_vm2, 0.0, %v63_v10  ;;  %v626_v19 = vpack.c.bf16 %v89_v14, %v88_v13  ;;  %v91_v22 = vld [vmem:[#allocation5 + $0x48] sm:$0xff]  ;;  %v92_v26 = vld [vmem:[#allocation5 + $0x50] sm:$0xff]  ;;  %v93_v27 = vld [vmem:[#allocation5 + $0x58] sm:$0xff] }
  0x3c   :  { %619 = vmatprep.subr.bf16.mxu0 %v842_v0  ;;  %643 = vmatprep.subr.bf16.mxu1 %v842_v0  ;;  %v67_v15 = vsel %vm66_vm1, %v923_v12, 0.0  ;;  %v74_v16 = vmul.f32 %v923_v12, %v923_v12  ;;  %v629_v25 = vpack.c.bf16 %v91_v22, %v90_v21  ;;  %v632_v30 = vpack.c.bf16 %v93_v27, %v92_v26  ;;  %v94_v31 = vld [vmem:[#allocation5 + $0x60] sm:$0xff]  ;;  %v95_v32 = vld [vmem:[#allocation5 + $0x68] sm:$0xff]  ;;  %v96_v36 = vld [vmem:[#allocation5 + $0x70] sm:$0xff] }
  0x3d   :  { %v68_v17 = vrot.slane %v67_v15, 4  ;;  %v635_v35 = vpack.c.bf16 %v95_v32, %v94_v31  ;;  %v97_v37 = vld [vmem:[#allocation5 + $0x78] sm:$0xff]  ;;  %v265_v43 = vld [vmem:[#allocation7 + $0x8] sm:$0xff]  ;;  %v264_v48 = vld [vmem:[#allocation7] sm:$0xff] }
  0x3e   :  { %v75_v18 = vsel %vm66_vm1, %v74_v16, 0.0  ;;  %v638_v40 = vpack.c.bf16 %v97_v37, %v96_v36  ;;  %v269_v44 = vld [vmem:[#allocation7 + $0x28] sm:$0xff]  ;;  %v267_v45 = vld [vmem:[#allocation7 + $0x18] sm:$0xff]  ;;  %v268_v49 = vld [vmem:[#allocation7 + $0x20] sm:$0xff] }
  0x3f   :  { %621 = vmatpush3.bf16.msra.mxu0 %v620_v7  ;;  %645 = vmatpush3.bf16.msra.mxu1 %v620_v7  ;;  %v76_v20 = vrot.slane %v75_v18, 4  ;;  %v69_v23 = vadd.f32 %v68_v17, %v67_v15  ;;  %v664_v46 = vpack.c.bf16 %v269_v44, %v265_v43  ;;  %v271_v47 = vld [vmem:[#allocation7 + $0x38] sm:$0xff]  ;;  %v666_v51 = vpack.c.bf16 %v268_v49, %v264_v48  ;;  %v266_v52 = vld [vmem:[#allocation7 + $0x10] sm:$0xff]  ;;  %v273_v55 = vld [vmem:[#allocation7 + $0x48] sm:$0xff] }
  0x40   :  { %622 = vmatprep.subr.bf16.mxu0 %v842_v0  ;;  %646 = vmatprep.subr.bf16.mxu1 %v842_v0  ;;  %v696_v50 = vpack.c.bf16 %v271_v47, %v267_v45  ;;  %v270_v53 = vld [vmem:[#allocation7 + $0x30] sm:$0xff]  ;;  %v277_v56 = vld [vmem:[#allocation7 + $0x68] sm:$0xff]  ;;  %v275_v57 = vld [vmem:[#allocation7 + $0x58] sm:$0xff] }
  0x41   :  { %v77_v24 = vadd.f32 %v76_v20, %v75_v18  ;;  %v70_v28 = vrot.slane %v69_v23, 2  ;;  %v698_v54 = vpack.c.bf16 %v270_v53, %v266_v52  ;;  %v668_v58 = vpack.c.bf16 %v277_v56, %v273_v55  ;;  %v279_v59 = vld [vmem:[#allocation7 + $0x78] sm:$0xff]  ;;  %v272_v60 = vld [vmem:[#allocation7 + $0x40] sm:$0xff]  ;;  %v281_v3 = vld [vmem:[#allocation7 + $0x88] sm:$0xff] }
  0x42   :  { %v276_v61 = vld [vmem:[#allocation7 + $0x60] sm:$0xff]  ;;  %v700_v62 = vpack.c.bf16 %v279_v59, %v275_v57  ;;  %v285_v4 = vld [vmem:[#allocation7 + $0xa8] sm:$0xff]  ;;  %v283_v5 = vld [vmem:[#allocation7 + $0x98] sm:$0xff] }
  0x43   :  { %624 = vmatpush3.bf16.msra.mxu0 %v623_v11  ;;  %648 = vmatpush3.bf16.msra.mxu1 %v623_v11  ;;  %v78_v29 = vrot.slane %v77_v24, 2  ;;  %v71_v33 = vadd.f32 %v70_v28, %v69_v23  ;;  %v670_v63 = vpack.c.bf16 %v276_v61, %v272_v60  ;;  %v672_v6 = vpack.c.bf16 %v285_v4, %v281_v3  ;;  %v287_v7 = vld [vmem:[#allocation7 + $0xb8] sm:$0xff]  ;;  %v280_v8 = vld [vmem:[#allocation7 + $0x80] sm:$0xff]  ;;  %v282_v13 = vld [vmem:[#allocation7 + $0x90] sm:$0xff] }
  0x44   :  { %625 = vmatprep.subr.bf16.mxu0 %v842_v0  ;;  %649 = vmatprep.subr.bf16.mxu1 %v842_v0  ;;  %v284_v9 = vld [vmem:[#allocation7 + $0xa0] sm:$0xff]  ;;  %v704_v10 = vpack.c.bf16 %v287_v7, %v283_v5  ;;  %v286_v14 = vld [vmem:[#allocation7 + $0xb0] sm:$0xff]  ;;  %v289_v16 = vld [vmem:[#allocation7 + $0xc8] sm:$0xff] }
  0x45   :  { %v79_v34 = vadd.f32 %v78_v29, %v77_v24  ;;  %v72_v38 = vrot.slane %v71_v33, 1  ;;  %v674_v11 = vpack.c.bf16 %v284_v9, %v280_v8  ;;  %v706_v15 = vpack.c.bf16 %v286_v14, %v282_v13  ;;  %v293_v17 = vld [vmem:[#allocation7 + $0xe8] sm:$0xff]  ;;  %v291_v18 = vld [vmem:[#allocation7 + $0xd8] sm:$0xff]  ;;  %v288_v21 = vld [vmem:[#allocation7 + $0xc0] sm:$0xff] }
  0x46   :  { %v295_v20 = vld [vmem:[#allocation7 + $0xf8] sm:$0xff]  ;;  %v292_v22 = vld [vmem:[#allocation7 + $0xe0] sm:$0xff]  ;;  %v294_v26 = vld [vmem:[#allocation7 + $0xf0] sm:$0xff] }
  0x47   :  { %627 = vmatpush3.bf16.msra.mxu0 %v626_v19  ;;  %651 = vmatpush3.bf16.msra.mxu1 %v626_v19  ;;  %v80_v39 = vrot.slane %v79_v34, 1  ;;  %v73_v41 = vadd.f32 %v72_v38, %v71_v33  ;;  %v676_v19 = vpack.c.bf16 %v293_v17, %v289_v16  ;;  %v708_v23 = vpack.c.bf16 %v295_v20, %v291_v18  ;;  %v297_v27 = vld [vmem:[#allocation7 + $0x108] sm:$0xff]  ;;  %v303_v31 = vld [vmem:[#allocation7 + $0x138] sm:$0xff]  ;;  %v298_v36 = vld [vmem:[#allocation7 + $0x110] sm:$0xff] }
  0x48   :  { %628 = vmatprep.subr.bf16.mxu0 %v842_v0  ;;  %652 = vmatprep.subr.bf16.mxu1 %v842_v0  ;;  %v678_v24 = vpack.c.bf16 %v292_v22, %v288_v21  ;;  %v301_v29 = vld [vmem:[#allocation7 + $0x128] sm:$0xff]  ;;  %v302_v38 = vld [vmem:[#allocation7 + $0x130] sm:$0xff]  ;;  %v307_v43 = vld [vmem:[#allocation7 + $0x158] sm:$0xff] }
  0x49   :  { %v81_v42 = vadd.f32 %v80_v39, %v79_v34  ;;  %v680_v32 = vpack.c.bf16 %v301_v29, %v297_v27  ;;  %v296_v34 = vld [vmem:[#allocation7 + $0x100] sm:$0xff]  ;;  %v305_v39 = vld [vmem:[#allocation7 + $0x148] sm:$0xff]  ;;  %v311_v44 = vld [vmem:[#allocation7 + $0x178] sm:$0xff] }
  0x4a   :  { %v304_v45 = vld [vmem:[#allocation7 + $0x140] sm:$0xff]  ;;  %v306_v48 = vld [vmem:[#allocation7 + $0x150] sm:$0xff]  ;;  %v317_v52 = vld [vmem:[#allocation7 + $0x1a8] sm:$0xff] }
  0x4b   :  { %630 = vmatpush3.bf16.msra.mxu0 %v629_v25  ;;  %654 = vmatpush3.bf16.msra.mxu1 %v629_v25  ;;  %v290_v25 = vld [vmem:[#allocation7 + $0xd0] sm:$0xff]  ;;  %v308_v47 = vld [vmem:[#allocation7 + $0x160] sm:$0xff]  ;;  %v315_v53 = vld [vmem:[#allocation7 + $0x198] sm:$0xff] }
  0x4c   :  { %631 = vmatprep.subr.bf16.mxu0 %v842_v0  ;;  %655 = vmatprep.subr.bf16.mxu1 %v842_v0  ;;  %v710_v28 = vpack.c.bf16 %v294_v26, %v290_v25  ;;  %v310_v49 = vld [vmem:[#allocation7 + $0x170] sm:$0xff]  ;;  %v319_v56 = vld [vmem:[#allocation7 + $0x1b8] sm:$0xff]  ;;  %v312_v57 = vld [vmem:[#allocation7 + $0x180] sm:$0xff] }
  0x4d   :  { %v720_v59 = vpack.c.bf16 %v319_v56, %v315_v53  ;;  %v314_v60 = vld [vmem:[#allocation7 + $0x190] sm:$0xff]  ;;  %v320_v5 = vld [vmem:[#allocation7 + $0x1c0] sm:$0xff]  ;;  %v243_v25 = vld [vmem:[%s966_s2] sm:$0x1]  ;;  %s845_s2 = smov [#allocation8]  }
  0x4e   :  { %v318_v61 = vld [vmem:[#allocation7 + $0x1b0] sm:$0xff]  ;;  %v247_v29 = vld [vmem:[%s967_s3] sm:$0x1]  ;;  %s502_s3 = sshll.u32 %s845_s2, 4  ;;  %s503_s3 = int_to_ptr.vmem [resolvable:$true] %s502_s3 }
  0x4f   :  { %633 = vmatpush3.bf16.msra.mxu0 %v632_v30  ;;  %657 = vmatpush3.bf16.msra.mxu1 %v632_v30  ;;  %v299_v30 = vld [vmem:[#allocation7 + $0x118] sm:$0xff]  ;;  %v722_v3 = vpack.c.bf16 %v318_v61, %v314_v60  ;;  %v322_v8 = vld [vmem:[#allocation7 + $0x1d0] sm:$0xff]  ;;  %p812_p11 = scmp.lt.s32.totalorder %s503_s3, %s503_s3 }
  0x50   :  { %634 = vmatprep.subr.bf16.mxu0 %v842_v0  ;;  %658 = vmatprep.subr.bf16.mxu1 %v842_v0  ;;  %v712_v33 = vpack.c.bf16 %v303_v31, %v299_v30  ;;  %v326_v9 = vld [vmem:[#allocation7 + $0x1f0] sm:$0xff] }
  0x53   :  { %636 = vmatpush3.bf16.msra.mxu0 %v635_v35  ;;  %660 = vmatpush3.bf16.msra.mxu1 %v635_v35  ;;  %v300_v35 = vld [vmem:[#allocation7 + $0x120] sm:$0xff] }
  0x54   :  { %637 = vmatprep.subr.bf16.mxu0 %v842_v0  ;;  %661 = vmatprep.subr.bf16.mxu1 %v842_v0  ;;  %v274_v0 = vld [vmem:[#allocation7 + $0x50] sm:$0xff]  ;;  %v682_v37 = vpack.c.bf16 %v300_v35, %v296_v34 }
  0x57   :  { %639 = vmatpush3.bf16.msra.mxu0 %v638_v40  ;;  %663 = vmatpush3.bf16.msra.mxu1 %v638_v40  ;;  %v309_v40 = vld [vmem:[#allocation7 + $0x168] sm:$0xff] }
  0x58   :  { %665 = vmatprep.subr.bf16.mxu0 %v664_v46  ;;  %697 = vmatprep.subr.bf16.mxu1 %v696_v50  ;;  %v716_v46 = vpack.c.bf16 %v311_v44, %v307_v43  ;;  %v686_v50 = vpack.c.bf16 %v308_v47, %v304_v45 }
  0x5a   :  { %579 = vmatmul.mubr.f32.vlgmr.msra.gmra.mrb[0].mxu0 %v73_v41  ;;  %614 = vmatmul.mubr.f32.vlgmr.msra.gmra.mrb[0].mxu1 %v81_v42  ;;  %v714_v41 = vpack.c.bf16 %v302_v38, %v298_v36  ;;  %v684_v42 = vpack.c.bf16 %v309_v40, %v305_v39 }
  0x5b   :  { %414 = vmatprep.mubr.f32.mxu0 %v844_v1  ;;  %485 = vmatprep.mubr.f32.mxu1 %v844_v1  ;;  %v278_v1 = vld [vmem:[#allocation7 + $0x70] sm:$0xff] }
  0x5c   :  { %667 = vmatpush1.bf16.msra.mxu0 %v666_v51  ;;  %699 = vmatpush1.bf16.msra.mxu1 %v698_v54  ;;  %v702_v2 = vpack.c.bf16 %v278_v1, %v274_v0  ;;  %v313_v51 = vld [vmem:[#allocation7 + $0x188] sm:$0xff]  ;;  %v718_v54 = vpack.c.bf16 %v310_v49, %v306_v48  ;;  %v323_v0 = vld [vmem:[#allocation7 + $0x1d8] sm:$0xff] }
  0x5d   :  { %669 = vmatprep.subr.bf16.mxu0 %v668_v58  ;;  %701 = vmatprep.subr.bf16.mxu1 %v700_v62  ;;  %v688_v55 = vpack.c.bf16 %v317_v52, %v313_v51  ;;  %v316_v58 = vld [vmem:[#allocation7 + $0x1a0] sm:$0xff]  ;;  %v321_v62 = vld [vmem:[#allocation7 + $0x1c8] sm:$0xff]  ;;  %v327_v1 = vld [vmem:[#allocation7 + $0x1f8] sm:$0xff] }
  0x5e   :  { %v724_v7 = vpack.c.bf16 %v327_v1, %v323_v0 }
  0x60   :  { %671 = vmatpush1.bf16.msra.mxu0 %v670_v63  ;;  %703 = vmatpush1.bf16.msra.mxu1 %v702_v2  ;;  %v325_v63 = vld [vmem:[#allocation7 + $0x1e8] sm:$0xff]  ;;  %v690_v2 = vpack.c.bf16 %v316_v58, %v312_v57 }
  0x61   :  { %673 = vmatprep.subr.bf16.mxu0 %v672_v6  ;;  %705 = vmatprep.subr.bf16.mxu1 %v704_v10  ;;  %v692_v4 = vpack.c.bf16 %v325_v63, %v321_v62  ;;  %v324_v6 = vld [vmem:[#allocation7 + $0x1e0] sm:$0xff] }
  0x62   :  { %v694_v10 = vpack.c.bf16 %v324_v6, %v320_v5 }
  0x64   :  { %675 = vmatpush1.bf16.msra.mxu0 %v674_v11  ;;  %707 = vmatpush1.bf16.msra.mxu1 %v706_v15  ;;  %v726_v11 = vpack.c.bf16 %v326_v9, %v322_v8 }
  0x65   :  { %677 = vmatprep.subr.bf16.mxu0 %v676_v19  ;;  %709 = vmatprep.subr.bf16.mxu1 %v708_v23  ;;  %v251_v23 = vlaneseq }
  0x68   :  { %679 = vmatpush1.bf16.msra.mxu0 %v678_v24  ;;  %711 = vmatpush1.bf16.msra.mxu1 %v710_v28  ;;  %v252_v24 = vshrl.u32 %v251_v23, 7 }
  0x69   :  { %681 = vmatprep.subr.bf16.mxu0 %v680_v32  ;;  %713 = vmatprep.subr.bf16.mxu1 %v712_v33 }
  0x6a   :  { %v253_v26 = vsub.s32 0, %v252_v24  ;;  %v340_v36 = vsub.s32 2, %v252_v24  ;;  %v336_v38 = vsub.s32 1, %v252_v24  ;;  %v344_v39 = vsub.s32 3, %v252_v24 }
  0x6c   :  { %683 = vmatpush1.bf16.msra.mxu0 %v682_v37  ;;  %715 = vmatpush1.bf16.msra.mxu1 %v714_v41  ;;  %v328_v37 = vld [vmem:[%s969_s5] sm:$0xf]  ;;  %s807_s5 = scalar_lea.vmem %s503_s3, 512 }
  0x6d   :  { %685 = vmatprep.subr.bf16.mxu0 %v684_v42  ;;  %717 = vmatprep.subr.bf16.mxu1 %v716_v46  ;;  %v333_v40 = vrot.slane %v328_v37, %v253_v26  ;;  %v341_v41 = vrot.slane %v328_v37, %v340_v36  ;;  %v337_v42 = vrot.slane %v328_v37, %v336_v38  ;;  %p808_p10 = scmp.ne.s32.totalorder %s503_s3, %s807_s5  ;;  %p813_p12 = scmp.lt.s32.totalorder %s807_s5, %s807_s5 }
  0x6e   :  { %v345_v43 = vrot.slane %v328_v37, %v344_v39 }
  0x6f   :  { %p814_p13 = por %p813_p12, %p812_p11 }
  0x70   :  { %687 = vmatpush1.bf16.msra.mxu0 %v686_v50  ;;  %719 = vmatpush1.bf16.msra.mxu1 %v718_v54 }
  0x71   :  { %689 = vmatprep.subr.bf16.mxu0 %v688_v55  ;;  %721 = vmatprep.subr.bf16.mxu1 %v720_v59  ;;  %p815_p0 = pnand %p814_p13, %p808_p10 }
  0x74   :  { %691 = vmatpush1.bf16.msra.mxu0 %v690_v2  ;;  %723 = vmatpush1.bf16.msra.mxu1 %v722_v3 }
  0x75   :  { %693 = vmatprep.subr.bf16.mxu0 %v692_v4  ;;  %725 = vmatprep.subr.bf16.mxu1 %v724_v7 }
  0x78   :  { %695 = vmatpush1.bf16.msra.mxu0 %v694_v10  ;;  %727 = vmatpush1.bf16.msra.mxu1 %v726_v11 }
 0x12d   :  { %v164_v13 = vpop.f32.mrb[0].mxu0  ;;  %v235_v14 = vpop.f32.mrb[0].mxu1 }
 0x12e   :  { %v168_v15 = vmul.f32 0.014285714, %v164_v13  ;;  %v580_v16 = vpop.f32.mrb[1].mxu0  ;;  %v239_v17 = vmul.f32 0.014285714, %v235_v14  ;;  %v615_v18 = vpop.f32.mrb[1].mxu1 }
 0x130   :  { %v240_v19 = vmul.f32 %v168_v15, %v168_v15 }
 0x132   :  { %v241_v20 = vsub.f32 %v239_v17, %v240_v19 }
 0x134   :  { %v242_v21 = vmax.f32 %v241_v20, 0.0 }
 0x136   :  { %v244_v22 = vadd.f32 1e-05, %v242_v21 }
 0x138   :  { %739 = vrsqrt.f32 %v244_v22 }
 0x142   :  { %v740_v27 = vpop.eup %739 }
 0x143   :  { %v246_v28 = vmul.f32 %v740_v27, %v243_v25 }
 0x145   :  { %v248_v30 = vmul.f32 %v246_v28, %v168_v15  ;;  %v254_v31 = vrot.slane %v246_v28, %v253_v26 }
 0x147   :  { %v249_v32 = vsub.f32 %v247_v29, %v248_v30  ;;  %v256_v33 = vmul.f32 %v254_v31, %v923_v12 }
 0x149   :  { %v261_v34 = vrot.slane %v249_v32, %v253_v26 }
 0x14b   :  { %v263_v35 = vadd.f32 %v261_v34, %v256_v33 }
 0x14d   :  { %415 = vmatmul.mubr.f32.vlgmr.msra.gmra.mrb[2].mxu0 %v263_v35  ;;  %486 = vmatmul.mubr.f32.vlgmr.msra.gmra.mrb[2].mxu1 %v263_v35 }
 0x220   :  { %v416_v44 = vpop.f32.mrb[2].mxu0  ;;  %v487_v45 = vpop.f32.mrb[2].mxu1 }
 0x221   :  { %v417_v12 = vadd.f32 %v416_v44, %v333_v40  ;;  %v488_v46 = vadd.f32 %v487_v45, %v341_v41  ;;  %v418_v47 = vpop.f32.mrb[3].mxu0  ;;  %v489_v48 = vpop.f32.mrb[3].mxu1 }
 0x222   :  { %v419_v49 = vadd.f32 %v418_v47, %v337_v42  ;;  %v490_v50 = vadd.f32 %v489_v48, %v345_v43 }
 0x223   :  { %492 = vst [vmem:[#allocation8] sm:$0x1f] %v417_v12  ;;  %494 = vst [vmem:[#allocation8 + $0x10] sm:$0x1f] %v488_v46 }
 0x224   :  { %493 = vst [vmem:[#allocation8 + $0x8] sm:$0x1f] %v419_v49  ;;  %495 = vst [vmem:[#allocation8 + $0x18] sm:$0x1f] %v490_v50 }
 0x225   :  { %818 = shalt.err (!%p815_p0)
}
 0x226   :  { %s819_s18 = scalar_lea.hbm %s970_s6, 512 }
 0x227   :  { %p820_p1 = scmp.ne.s32.totalorder %s970_s6, %s819_s18  ;;  %p823_p2 = scmp.lt.u32.totalorder %s819_s18, %s970_s6 }
 0x229   :  { %p825_p3 = pnand %p823_p2, %p820_p1 }
 0x22b   :  { %828 = shalt.err (!%p825_p3)
}
 0x22c   :  { %505 = dma.vmem_to_hbm [thread:$0]  %s503_s3, 512, %s970_s6, [#allocation4]  }
 0x22d   :  { %833 = dma.done.wait [#allocation4], 512  }
 0x22e   :  { %834 = vsyncadd [#allocation4], 4294966784 }
 0x22f   :  { %509 = vsyncpa [#allocation3], 1 }
 0x230   :  { %510 = vsyncpa [#allocation6], 1 }
 0x231   :  { %511 = vsyncpa [#allocation4], 1 }

</bundles_post_ra>
